<compile_context>
chip_gen: v6e
topology: v6e:2x2x1
jax: 0.10.0
libtpu: 0.0.40
codegen_flags: <defaults>
</compile_context>

<pallas_src>
import functools

import jax
import jax.numpy as jnp
from jax.experimental import pallas as pl
from jax.experimental.pallas import tpu as pltpu


def _round_up(x, m):
    return ((x + m - 1) // m) * m


def _layernorm_kernel(x_ref, w_ref, b_ref, o_ref, *, eps):
    # Compute in fp32 regardless of input dtype (memory-bound => free,
    # matches the module's upcast=True behavior for 16-bit inputs).
    x = x_ref[...].astype(jnp.float32)
    d = x.shape[-1]
    inv_d = jnp.float32(1.0 / d)
    # Two-pass moments over the lane (feature) axis: numerically robust.
    mean = jnp.sum(x, axis=-1, keepdims=True) * inv_d
    xc = x - mean
    var = jnp.sum(xc * xc, axis=-1, keepdims=True) * inv_d
    inv = jax.lax.rsqrt(var + jnp.float32(eps))
    # weight/bias are already fp32, shape (1, D), broadcast over rows.
    y = xc * inv * w_ref[...] + b_ref[...]
    o_ref[...] = y.astype(o_ref.dtype)


def _vmem_capacity_bytes():
    try:
        info = pltpu.get_tpu_info()
        return int(getattr(info, "vmem_capacity_bytes", 64 * 1024 * 1024))
    except Exception:  # pragma: no cover - conservative fallback
        return 64 * 1024 * 1024


def layer_norm_pallas(x, weight=None, bias=None, *, eps=1e-5, upcast=True,
                      row_tile=None):
    """LayerNorm over the last axis of x. Returns same shape & dtype as x.

    Note: internal math is always fp32; for upcast=False with 16-bit inputs
    this is a (strictly better-precision) approximation of the torch path.
    """
    del upcast  # output dtype == input dtype always; math always fp32.
    orig_shape = x.shape
    orig_dtype = x.dtype
    D = orig_shape[-1]
    if weight is None:
        weight = jnp.ones((D,), jnp.float32)   # create_scale=False fallback
    if bias is None:
        bias = jnp.zeros((D,), jnp.float32)    # create_offset=False fallback
    assert weight.shape == (D,) and bias.shape == (D,)

    x2 = x.reshape(-1, D)
    R = x2.shape[0]
    itemsize = jnp.dtype(orig_dtype).itemsize
    # Minimum sublane count that respects dtype packing (fp32:8, bf16:16, i8:32).
    sublane_min = max(8, 32 // max(1, itemsize))
    # Lane-padded feature width: VMEM tiles / vregs pad the lane axis to 128.
    D_pad = _round_up(D, 128)

    # Generation-aware targets.
    vmem_capacity = _vmem_capacity_bytes()
    if vmem_capacity >= 100 * 1024 * 1024:       # v5e / v6e (128 MiB VMEM)
        target_io_bytes = 8 * 1024 * 1024        # in+out HBM traffic per block
        vmem_cap = 96 * 1024 * 1024
    else:                                        # v7x (64 MiB VMEM per TC)
        target_io_bytes = 4 * 1024 * 1024
        vmem_cap = 48 * 1024 * 1024

    # Per-row VMEM footprint: double-buffered in + out tiles (padded lanes,
    # native dtype) + fp32 working set (x, xc, products, y).
    per_row_vmem = 4 * D_pad * itemsize + 4 * D_pad * 4

    if row_tile is None:
        # Size by actual HBM I/O bytes so bf16 blocks aren't half-sized.
        rt = max(sublane_min, target_io_bytes // (2 * D * itemsize))
        # Keep the block's VMEM footprint comfortably under the scoped limit.
        rt = min(rt, max(sublane_min, int(0.75 * vmem_cap) // per_row_vmem))
        # Guarantee >=2 grid steps (megacore sharding on v7x) when we have
        # enough rows; negligible overhead on single-TC chips.
        if R >= 2 * sublane_min:
            rt = min(rt, _round_up(pl.cdiv(R, 2), 32))
        # Don't allocate a block far larger than the data itself.
        rt = min(rt, _round_up(R, 32))
        if rt >= 32:
            rt = (rt // 32) * 32          # multiple of 32: safe for all dtypes
        else:
            rt = _round_up(max(rt, sublane_min), sublane_min)
        row_tile = max(sublane_min, rt)
    else:
        rt = int(row_tile)
        if rt >= 32:
            rt = (rt // 32) * 32
        else:
            rt = sublane_min              # never below the dtype packing min
        row_tile = rt

    grid = pl.cdiv(R, row_tile)

    # VMEM budget (lane-padded): double-buffered input + output blocks, fp32
    # intermediates, resident weight/bias, plus headroom.
    block_io = row_tile * D_pad * itemsize
    block_f32 = row_tile * D_pad * 4
    vmem_need = 4 * block_io + 4 * block_f32 + 2 * D_pad * 4 + (2 << 20)
    vmem_limit = int(min(max(32 * 1024 * 1024, vmem_need), vmem_cap))

    kernel = functools.partial(_layernorm_kernel, eps=float(eps))

    # Pre-cast params to fp32 here: constant index_map keeps them resident in
    # VMEM, so the kernel body stays x-only work.
    w2 = weight.astype(jnp.float32).reshape(1, D)
    b2 = bias.astype(jnp.float32).reshape(1, D)

    out = pl.pallas_call(
        kernel,
        out_shape=jax.ShapeDtypeStruct((R, D), orig_dtype),
        grid_spec=pltpu.PrefetchScalarGridSpec(
            num_scalar_prefetch=0,
            grid=(grid,),
            in_specs=[
                pl.BlockSpec((row_tile, D), lambda i: (i, 0)),
                pl.BlockSpec((1, D), lambda i: (0, 0)),
                pl.BlockSpec((1, D), lambda i: (0, 0)),
            ],
            out_specs=pl.BlockSpec((row_tile, D), lambda i: (i, 0)),
        ),
        compiler_params=pltpu.CompilerParams(
            dimension_semantics=("parallel",),
            vmem_limit_bytes=vmem_limit,
        ),
    )(x2, w2, b2)

    return out.reshape(orig_shape)


def _reference_layer_norm(x, weight, bias, eps=1e-5, upcast=True):
    dtype = x.dtype
    is_16bit = dtype in (jnp.float16, jnp.bfloat16)
    xf = x.astype(jnp.float32) if (upcast and is_16bit) else x
    mean = jnp.mean(xf, axis=-1, keepdims=True)
    var = jnp.mean((xf - mean) ** 2, axis=-1, keepdims=True)
    out = (xf - mean) * jax.lax.rsqrt(var + eps)
    out = out * weight.astype(out.dtype) + bias.astype(out.dtype)
    return out.astype(dtype) if (upcast and is_16bit) else out


if __name__ == "__main__":
    key = jax.random.PRNGKey(0)
    k1, k2, k3, k4 = jax.random.split(key, 4)

    B, S, D = 2, 8, 32  # normalized_shape = D = 32

    weight = jnp.ones((D,), jnp.float32) + 0.1 * jax.random.normal(k2, (D,))
    bias = jnp.zeros((D,), jnp.float32) + 0.1 * jax.random.normal(k3, (D,))

    # fp32 input
    x_f32 = jax.random.normal(k1, (B, S, D), dtype=jnp.float32)
    out_f32 = jax.block_until_ready(
        layer_norm_pallas(x_f32, weight, bias, eps=1e-5)
    )
    ref_f32 = _reference_layer_norm(x_f32, weight, bias)
    assert out_f32.dtype == x_f32.dtype
    assert jnp.max(jnp.abs(out_f32 - ref_f32)) < 1e-5

    # bf16 input (upcast path: compute fp32, cast result back to bf16)
    x_bf16 = x_f32.astype(jnp.bfloat16)
    out_bf16 = jax.block_until_ready(
        layer_norm_pallas(x_bf16, weight, bias, eps=1e-5)
    )
    ref_bf16 = _reference_layer_norm(x_bf16, weight, bias)
    assert out_bf16.dtype == jnp.bfloat16
    assert jnp.max(
        jnp.abs(out_bf16.astype(jnp.float32) - ref_bf16.astype(jnp.float32))
    ) < 2e-2

    # Ragged row count (R % tile != 0): exercises the masked partial block,
    # no wrapper-side padding copies; check no padded-row garbage leaks.
    x_rag = jax.random.normal(k4, (3, 7, D), dtype=jnp.float32)
    out_rag = jax.block_until_ready(layer_norm_pallas(x_rag, weight, bias))
    ref_rag = _reference_layer_norm(x_rag, weight, bias)
    assert bool(jnp.all(jnp.isfinite(out_rag)))
    assert jnp.max(jnp.abs(out_rag - ref_rag)) < 1e-5

    # Lane-dense feature dim (multiple of 128), as in real deployments, with
    # a row count that forces a multi-step grid and an explicit row_tile that
    # must be rounded for bf16 sublane packing.
    D2 = 128
    w128 = jnp.ones((D2,), jnp.float32)
    b128 = jnp.zeros((D2,), jnp.float32)
    x128 = jax.random.normal(k1, (4, 96, D2), dtype=jnp.float32)
    out128 = jax.block_until_ready(layer_norm_pallas(x128, w128, b128))
    ref128 = _reference_layer_norm(x128, w128, b128)
    assert jnp.max(jnp.abs(out128 - ref128)) < 1e-5

    x128b = x128.astype(jnp.bfloat16)
    out128b = jax.block_until_ready(
        layer_norm_pallas(x128b, w128, b128, row_tile=40)  # rounds to 32
    )
    ref128b = _reference_layer_norm(x128b, w128, b128)
    assert jnp.max(
        jnp.abs(out128b.astype(jnp.float32) - ref128b.astype(jnp.float32))
    ) < 2e-2

    print("KERNEL_OK")
</pallas_src>

<mosaic_0001>
module attributes {stable_mosaic.version = 11 : i64} {
  func.func @_layernorm_kernel(%arg0: i32, %arg1: memref<32x32xf32, #tpu.memory_space<vmem>>, %arg2: memref<1x32xf32, #tpu.memory_space<vmem>>, %arg3: memref<1x32xf32, #tpu.memory_space<vmem>>, %arg4: memref<32x32xf32, #tpu.memory_space<vmem>>) attributes {dimension_semantics = [#tpu.dimension_semantics<parallel>], iteration_bounds = array<i64: 1>, scalar_prefetch = 0 : i64, scratch_operands = 0 : i64, tpu.core_type = #tpu.core_type<tc>, window_params = [{transform_indices = @transform_0, window_bounds = array<i64: 32, 32>}, {pipeline_mode = #tpu.pipeline_mode<synchronous>, transform_indices = @transform_1, window_bounds = array<i64: 1, 32>}, {pipeline_mode = #tpu.pipeline_mode<synchronous>, transform_indices = @transform_2, window_bounds = array<i64: 1, 32>}, {transform_indices = @transform_3, window_bounds = array<i64: 32, 32>}]} {
    %c0 = arith.constant 0 : index
    %c0_0 = arith.constant 0 : index
    %0 = vector.load %arg1[%c0, %c0_0] : memref<32x32xf32, #tpu.memory_space<vmem>>, vector<32x32xf32>
    %cst = arith.constant dense<0.000000e+00> : vector<32xf32>
    %1 = vector.multi_reduction <add>, %0, %cst [1] : vector<32x32xf32> to vector<32xf32>
    %2 = vector.shape_cast %1 : vector<32xf32> to vector<32x1xf32>
    %cst_1 = arith.constant 3.125000e-02 : f32
    %3 = vector.broadcast %cst_1 : f32 to vector<32x1xf32>
    %4 = arith.mulf %2, %3 : vector<32x1xf32>
    %5 = vector.broadcast %4 : vector<32x1xf32> to vector<32x32xf32>
    %6 = arith.subf %0, %5 : vector<32x32xf32>
    %7 = arith.mulf %6, %6 : vector<32x32xf32>
    %cst_2 = arith.constant dense<0.000000e+00> : vector<32xf32>
    %8 = vector.multi_reduction <add>, %7, %cst_2 [1] : vector<32x32xf32> to vector<32xf32>
    %9 = vector.shape_cast %8 : vector<32xf32> to vector<32x1xf32>
    %cst_3 = arith.constant 3.125000e-02 : f32
    %10 = vector.broadcast %cst_3 : f32 to vector<32x1xf32>
    %11 = arith.mulf %9, %10 : vector<32x1xf32>
    %cst_4 = arith.constant 9.99999974E-6 : f32
    %12 = vector.broadcast %cst_4 : f32 to vector<32x1xf32>
    %13 = arith.addf %11, %12 : vector<32x1xf32>
    %14 = math.rsqrt %13 : vector<32x1xf32>
    %15 = vector.broadcast %14 : vector<32x1xf32> to vector<32x32xf32>
    %16 = arith.mulf %6, %15 : vector<32x32xf32>
    %c0_5 = arith.constant 0 : index
    %c0_6 = arith.constant 0 : index
    %17 = vector.load %arg2[%c0_5, %c0_6] : memref<1x32xf32, #tpu.memory_space<vmem>>, vector<1x32xf32>
    %18 = vector.broadcast %17 : vector<1x32xf32> to vector<32x32xf32>
    %19 = arith.mulf %16, %18 : vector<32x32xf32>
    %c0_7 = arith.constant 0 : index
    %c0_8 = arith.constant 0 : index
    %20 = vector.load %arg3[%c0_7, %c0_8] : memref<1x32xf32, #tpu.memory_space<vmem>>, vector<1x32xf32>
    %21 = vector.broadcast %20 : vector<1x32xf32> to vector<32x32xf32>
    %22 = arith.addf %19, %21 : vector<32x32xf32>
    %c0_9 = arith.constant 0 : index
    %c0_10 = arith.constant 0 : index
    %23 = vector.load %arg4[%c0_9, %c0_10] : memref<32x32xf32, #tpu.memory_space<vmem>>, vector<32x32xf32>
    tpu.vector_store %arg4[%c0_9, %c0_10], %22 {strides = array<i32>} : memref<32x32xf32, #tpu.memory_space<vmem>>, vector<32x32xf32>,
    return
  }
  func.func @transform_0(%arg0: i32) -> (i32, i32) {
    %c0_i32 = arith.constant 0 : i32
    %c0_i32_0 = arith.constant 0 : i32
    return %arg0, %c0_i32 : i32, i32
  }
  func.func @transform_1(%arg0: i32) -> (i32, i32) {
    %c0_i32 = arith.constant 0 : i32
    %c0_i32_0 = arith.constant 0 : i32
    %c0_i32_1 = arith.constant 0 : i32
    return %c0_i32, %c0_i32_0 : i32, i32
  }
  func.func @transform_2(%arg0: i32) -> (i32, i32) {
    %c0_i32 = arith.constant 0 : i32
    %c0_i32_0 = arith.constant 0 : i32
    %c0_i32_1 = arith.constant 0 : i32
    return %c0_i32, %c0_i32_0 : i32, i32
  }
  func.func @transform_3(%arg0: i32) -> (i32, i32) {
    %c0_i32 = arith.constant 0 : i32
    %c0_i32_0 = arith.constant 0 : i32
    return %arg0, %c0_i32 : i32, i32
  }
}

</mosaic_0001>

<bundles_post_ra>
// kernel: tpu_custom_call.1
= control target key start
LH: loop header
LB: loop body
LE: loop exit
PB: predicated region body
PF: predicated region fallthrough
CT: control target
= control target key end

     0   :  { %8 = vsyncpa [#allocation3], 0  ;;  %s241_s0 = inlined_call_operand.hbm [shape: f32[16,32], index: 0, kind: input, shape index: {}]   ;;  %s242_s1 = inlined_call_operand.vmem [shape: f32[1,32], index: 1, kind: input, shape index: {}]   ;;  %s243_s2 = inlined_call_operand.vmem [shape: f32[1,32], index: 2, kind: input, shape index: {}]   ;;  %s244_s3 = inlined_call_operand.hbm [shape: f32[16,32], index: 3, kind: output, shape index: {}]  }
   0x1   :  { %9 = vsyncpa [#allocation4], 0 }
   0x2   :  { %14 = vsyncadd [#allocation3], 256  ;;  %s187_s12 = smov [#allocation2]  }
   0x3   :  { %s15_s13 = sshll.u32 %s187_s12, 4  ;;  %s16_s13 = int_to_ptr.vmem [resolvable:$true] %s15_s13 }
   0x4   :  { %s151_s14 = scalar_lea.vmem %s16_s13, 256  ;;  %s155_s15 = scalar_lea.vmem %s16_s13, 512 }
   0x5   :  { %p152_p0 = scmp.ne.s32.totalorder %s16_s13, %s151_s14  ;;  %p156_p1 = scmp.lt.s32.totalorder %s16_s13, %s16_s13 }
   0x6   :  { %p157_p2 = scmp.lt.s32.totalorder %s155_s15, %s151_s14 }
   0x8   :  { %p158_p3 = por %p157_p2, %p156_p1 }
   0xa   :  { %p159_p4 = pnand %p158_p3, %p152_p0 }
   0xc   :  { %162 = shalt.err (!%p159_p4)
}
   0xd   :  { %s188_s16 = smov 128   ;;  %s189_s17 = smov 8  }
   0xe   :  { %21 = dma.hbm_to_vmem [thread:$0]  %s241_s0, 256, %s16_s13, [#allocation3], %s188_s16, %s188_s16, %s189_s17  }
   0xf   :  { %183 = dma.done.wait [#allocation3], 512  }
  0x10   :  { %184 = vsyncadd [#allocation3], 4294966784  ;;  %vm33_vm0 = vcmask 261120   ;;  %v29_v0 = vld [vmem:[#allocation2] sm:$0xff]  ;;  %v31_v1 = vld [vmem:[#allocation2 + $0x10] sm:$0xff] }
  0x11   :  { %v30_v2 = vld [vmem:[#allocation2 + $0x8] sm:$0xff]  ;;  %v34_v3 = vsel %vm33_vm0, %v29_v0, 0.0  ;;  %v40_v4 = vsel %vm33_vm0, %v31_v1, 0.0  ;;  %v32_v5 = vld [vmem:[#allocation2 + $0x18] sm:$0xff]  ;;  %v129_v41 = vld [vmem:[%s242_s1] ss:$0 sm:$0xff] }
  0x12   :  { %35 = vadd.xlane.f32.xlu0 %v34_v3  ;;  %41 = vadd.xlane.f32.xlu1 %v40_v4  ;;  %v37_v6 = vsel %vm33_vm0, %v30_v2, 0.0  ;;  %v43_v7 = vsel %vm33_vm0, %v32_v5, 0.0  ;;  %v130_v43 = vld [vmem:[%s243_s2] ss:$0 sm:$0xff] }
  0x16   :  { %38 = vadd.xlane.f32.xlu0 %v37_v6  ;;  %44 = vadd.xlane.f32.xlu1 %v43_v7 }
  0x9b   :  { %v36_v8 = vpop.xlane.xlu0 %35  ;;  %v42_v9 = vpop.xlane.xlu1 %41 }
  0x9c   :  { %v46_v10 = vmul.f32 0.03125, %v36_v8  ;;  %v48_v11 = vmul.f32 0.03125, %v42_v9 }
  0x9e   :  { %v50_v12 = vsub.f32 %v29_v0, %v46_v10  ;;  %v52_v13 = vsub.f32 %v31_v1, %v48_v11 }
  0x9f   :  { %v39_v14 = vpop.xlane.xlu0 %38  ;;  %v45_v15 = vpop.xlane.xlu1 %44 }
  0xa0   :  { %v47_v16 = vmul.f32 0.03125, %v39_v14  ;;  %v49_v17 = vmul.f32 0.03125, %v45_v15  ;;  %v54_v18 = vmul.f32 %v50_v12, %v50_v12  ;;  %v56_v19 = vmul.f32 %v52_v13, %v52_v13 }
  0xa2   :  { %v51_v20 = vsub.f32 %v30_v2, %v47_v16  ;;  %v53_v21 = vsub.f32 %v32_v5, %v49_v17  ;;  %v58_v22 = vsel %vm33_vm0, %v54_v18, 0.0  ;;  %v64_v23 = vsel %vm33_vm0, %v56_v19, 0.0 }
  0xa3   :  { %59 = vadd.xlane.f32.xlu0 %v58_v22 }
  0xa4   :  { %v55_v24 = vmul.f32 %v51_v20, %v51_v20  ;;  %v57_v25 = vmul.f32 %v53_v21, %v53_v21 }
  0xa6   :  { %v61_v26 = vsel %vm33_vm0, %v55_v24, 0.0  ;;  %v67_v27 = vsel %vm33_vm0, %v57_v25, 0.0 }
  0xa7   :  { %65 = vadd.xlane.f32.xlu0 %v64_v23  ;;  %62 = vadd.xlane.f32.xlu1 %v61_v26 }
  0xab   :  { %68 = vadd.xlane.f32.xlu1 %v67_v27 }
 0x12c   :  { %v60_v28 = vpop.xlane.xlu0 %59 }
 0x12d   :  { %v70_v29 = vmul.f32 0.03125, %v60_v28 }
 0x12f   :  { %v74_v30 = vadd.f32 1e-05, %v70_v29 }
 0x130   :  { %v63_v31 = vpop.xlane.xlu1 %62  ;;  %v66_v32 = vpop.xlane.xlu0 %65 }
 0x131   :  { %135 = vrsqrt.f32 %v74_v30  ;;  %v71_v33 = vmul.f32 0.03125, %v63_v31  ;;  %v72_v34 = vmul.f32 0.03125, %v66_v32 }
 0x133   :  { %v75_v35 = vadd.f32 1e-05, %v71_v33  ;;  %v76_v36 = vadd.f32 1e-05, %v72_v34 }
 0x134   :  { %v69_v37 = vpop.xlane.xlu1 %68 }
 0x135   :  { %137 = vrsqrt.f32 %v75_v35  ;;  %v73_v38 = vmul.f32 0.03125, %v69_v37 }
 0x136   :  { %139 = vrsqrt.f32 %v76_v36 }
 0x137   :  { %v77_v39 = vadd.f32 1e-05, %v73_v38 }
 0x139   :  { %141 = vrsqrt.f32 %v77_v39 }
 0x13e   :  { %v136_v40 = vpop.eup %135 }
 0x13f   :  { %v82_v42 = vmul.f32 %v136_v40, %v50_v12 }
 0x141   :  { %v93_v44 = vmul.f32 %v129_v41, %v82_v42 }
 0x142   :  { %v138_v45 = vpop.eup %137 }
 0x143   :  { %v140_v46 = vpop.eup %139  ;;  %v104_v47 = vadd.f32 %v130_v43, %v93_v44  ;;  %v83_v48 = vmul.f32 %v138_v45, %v51_v20 }
 0x144   :  { %v84_v49 = vmul.f32 %v140_v46, %v52_v13 }
 0x145   :  { %108 = vst.msk [vmem:[#allocation5] sm:$0xff] %vm33_vm0, %v104_v47  ;;  %v94_v50 = vmul.f32 %v129_v41, %v83_v48 }
 0x146   :  { %v142_v51 = vpop.eup %141  ;;  %v95_v52 = vmul.f32 %v129_v41, %v84_v49 }
 0x147   :  { %v105_v53 = vadd.f32 %v130_v43, %v94_v50  ;;  %v85_v54 = vmul.f32 %v142_v51, %v53_v21 }
 0x148   :  { %v106_v55 = vadd.f32 %v130_v43, %v95_v52 }
 0x149   :  { %109 = vst.msk [vmem:[#allocation5 + $0x8] sm:$0xff] %vm33_vm0, %v105_v53  ;;  %v96_v56 = vmul.f32 %v129_v41, %v85_v54 }
 0x14a   :  { %110 = vst.msk [vmem:[#allocation5 + $0x10] sm:$0xff] %vm33_vm0, %v106_v55 }
 0x14b   :  { %v107_v57 = vadd.f32 %v130_v43, %v96_v56 }
 0x14d   :  { %111 = vst.msk [vmem:[#allocation5 + $0x18] sm:$0xff] %vm33_vm0, %v107_v57 }
 0x14e   :  { %116 = vsyncadd [#allocation4], 256  ;;  %s190_s1 = smov [#allocation5]  }
 0x14f   :  { %s117_s2 = sshll.u32 %s190_s1, 4  ;;  %s118_s2 = int_to_ptr.vmem [resolvable:$true] %s117_s2 }
 0x150   :  { %s163_s23 = scalar_lea.vmem %s118_s2, 256  ;;  %s167_s24 = scalar_lea.vmem %s118_s2, 512 }
 0x151   :  { %p164_p5 = scmp.ne.s32.totalorder %s118_s2, %s163_s23  ;;  %p168_p6 = scmp.lt.s32.totalorder %s118_s2, %s118_s2 }
 0x152   :  { %p169_p7 = scmp.lt.s32.totalorder %s167_s24, %s163_s23 }
 0x154   :  { %p170_p8 = por %p169_p7, %p168_p6 }
 0x156   :  { %p171_p9 = pnand %p170_p8, %p164_p5 }
 0x158   :  { %174 = shalt.err (!%p171_p9)
}
 0x159   :  { %123 = dma.vmem_to_hbm [thread:$0]  %s118_s2, 256, %s244_s3, [#allocation4], %s188_s16, %s188_s16, %s189_s17  }
 0x15a   :  { %185 = dma.done.wait [#allocation4], 512  }
 0x15b   :  { %186 = vsyncadd [#allocation4], 4294966784 }
 0x15c   :  { %127 = vsyncpa [#allocation3], 1 }
 0x15d   :  { %128 = vsyncpa [#allocation4], 1 }

</bundles_post_ra>
